<compile_context>
chip_gen: v7x
topology: tpu7x:2x2x1
jax: 0.10.0
libtpu: 0.0.40
codegen_flags: <defaults>
</compile_context>

<pallas_src>
import jax
import jax.numpy as jnp
from jax import lax
from jax.experimental import pallas as pl
from jax.experimental.pallas import tpu as pltpu


def fused_gather_kernel(idx_ref, table_ref, o_ref):
    """o = one_hot(idx, V) @ fused_table  for one tile of tokens.

    idx_ref:   (tn, 1)  int32   token ids for this tile
    table_ref: (V, D)   f32     fused (embedding @ W^T + b) table, grid-invariant
    o_ref:     (tn, D)  f32     output rows for this tile
    """
    tn = o_ref.shape[0]
    V = table_ref.shape[0]

    idx = idx_ref[...]                                        # (tn, 1) int32
    col = lax.broadcasted_iota(jnp.int32, (tn, V), 1)         # (tn, V)
    one_hot = (col == idx).astype(jnp.float32)                # (tn, V)

    o_ref[...] = jnp.dot(one_hot, table_ref[...],
                         preferred_element_type=jnp.float32)


def embed_fused(idx_flat, fused_table, *, max_tile=512):
    """Gather rows of fused_table at idx_flat via the Pallas kernel.

    idx_flat:    (N,)   int32
    fused_table: (V, D) f32
    returns      (N, D) f32
    """
    n = int(idx_flat.shape[0])
    V, D = fused_table.shape

    # Token-tile size: multiple of 8 (sublane), capped at max_tile.
    tn = min(max_tile, max(8, -(-n // 8) * 8))
    n_pad = -(-n // tn) * tn

    idx2d = idx_flat.astype(jnp.int32).reshape(-1, 1)
    if n_pad != n:
        idx2d = jnp.pad(idx2d, ((0, n_pad - n), (0, 0)))      # pad with id 0 (in range)

    out = pl.pallas_call(
        fused_gather_kernel,
        out_shape=jax.ShapeDtypeStruct((n_pad, D), jnp.float32),
        grid_spec=pltpu.PrefetchScalarGridSpec(
            num_scalar_prefetch=0,
            grid=(n_pad // tn,),
            in_specs=[
                pl.BlockSpec((tn, 1), lambda i: (i, 0)),      # token ids, per tile
                pl.BlockSpec((V, D), lambda i: (0, 0)),       # fused table, loaded once
            ],
            out_specs=pl.BlockSpec((tn, D), lambda i: (i, 0)),
        ),
        compiler_params=pltpu.CompilerParams(
            dimension_semantics=("parallel",),
        ),
    )(idx2d, fused_table)

    return out[:n] if n_pad != n else out


def my_model_forward(x, table, w, b):
    """x: (B, S) int32 indices.  Equivalent to out(wte(x)) of the PyTorch module.

    table: (V, D) embedding weight; w: (D_out, D_in) Linear weight (PyTorch layout);
    b: (D_out,) Linear bias.
    """
    B, S = x.shape
    D_out = w.shape[0]
    # Fold the Linear into the table once (outside the kernel; ~0.5 MFLOP).
    fused_table = jnp.dot(table, w.T, preferred_element_type=jnp.float32) + b
    idx_flat = x.reshape(-1).astype(jnp.int32)
    out_flat = embed_fused(idx_flat, fused_table)
    return out_flat.reshape(B, S, D_out)


if __name__ == "__main__":
    VOCAB, D_MODEL = 1024, 16
    B, S = 2, 8

    key = jax.random.PRNGKey(0)
    k_x, k_emb, k_w, k_b = jax.random.split(key, 4)

    # Deterministic parameter init (matches the module's shapes).
    table = jax.random.normal(k_emb, (VOCAB, D_MODEL), dtype=jnp.float32)
    w = (jax.random.uniform(k_w, (D_MODEL, D_MODEL), dtype=jnp.float32) - 0.5) * 0.5
    b = (jax.random.uniform(k_b, (D_MODEL,), dtype=jnp.float32) - 0.5) * 0.5

    # Inputs: token indices.
    x = jax.random.randint(k_x, (B, S), 0, VOCAB, dtype=jnp.int32)

    out = my_model_forward(x, table, w, b)
    out = jax.block_until_ready(out)

    # Reference in plain JAX.
    ref = jnp.take(table, x, axis=0) @ w.T + b
    assert out.shape == (B, S, D_MODEL)
    assert jnp.allclose(out, ref, rtol=1e-5, atol=1e-5), "mismatch vs reference"

    print("KERNEL_OK")
</pallas_src>

<mosaic_0001>
module attributes {stable_mosaic.version = 11 : i64} {
  func.func @fused_gather_kernel(%arg0: i32, %arg1: memref<16x1xi32, #tpu.memory_space<vmem>>, %arg2: memref<1024x16xf32, #tpu.memory_space<vmem>>, %arg3: memref<16x16xf32, #tpu.memory_space<vmem>>) attributes {dimension_semantics = [#tpu.dimension_semantics<parallel>], iteration_bounds = array<i64: 1>, scalar_prefetch = 0 : i64, scratch_operands = 0 : i64, tpu.core_type = #tpu.core_type<tc>, window_params = [{transform_indices = @transform_0, window_bounds = array<i64: 16, 1>}, {pipeline_mode = #tpu.pipeline_mode<synchronous>, transform_indices = @transform_1, window_bounds = array<i64: 1024, 16>}, {transform_indices = @transform_2, window_bounds = array<i64: 16, 16>}]} {
    %c0 = arith.constant 0 : index
    %c0_0 = arith.constant 0 : index
    %0 = vector.load %arg1[%c0, %c0_0] : memref<16x1xi32, #tpu.memory_space<vmem>>, vector<16x1xi32>
    %1 = tpu.iota {dimensions = array<i32: 1>} : vector<16x1024xi32>
    %2 = vector.broadcast %0 : vector<16x1xi32> to vector<16x1024xi32>
    %3 = arith.cmpi eq, %1, %2 : vector<16x1024xi32>
    %4 = arith.extui %3 : vector<16x1024xi1> to vector<16x1024xi32>
    %5 = arith.sitofp %4 : vector<16x1024xi32> to vector<16x1024xf32>
    %c0_1 = arith.constant 0 : index
    %c0_2 = arith.constant 0 : index
    %6 = vector.load %arg2[%c0_1, %c0_2] : memref<1024x16xf32, #tpu.memory_space<vmem>>, vector<1024x16xf32>
    %cst = arith.constant dense<0.000000e+00> : vector<16x16xf32>
    %7 = tpu.matmul %5, %6, %cst {dimension_numbers = #tpu.dot_dimension_numbers<[1], [0], [0], [1], [0, 0, 1, 1], [], []>} : vector<16x1024xf32>, vector<1024x16xf32>, vector<16x16xf32> -> vector<16x16xf32>
    %c0_3 = arith.constant 0 : index
    %c0_4 = arith.constant 0 : index
    %8 = vector.load %arg3[%c0_3, %c0_4] : memref<16x16xf32, #tpu.memory_space<vmem>>, vector<16x16xf32>
    tpu.vector_store %arg3[%c0_3, %c0_4], %7 {strides = array<i32>} : memref<16x16xf32, #tpu.memory_space<vmem>>, vector<16x16xf32>,
    return
  }
  func.func @transform_0(%arg0: i32) -> (i32, i32) {
    %c0_i32 = arith.constant 0 : i32
    %c0_i32_0 = arith.constant 0 : i32
    return %arg0, %c0_i32 : i32, i32
  }
  func.func @transform_1(%arg0: i32) -> (i32, i32) {
    %c0_i32 = arith.constant 0 : i32
    %c0_i32_0 = arith.constant 0 : i32
    %c0_i32_1 = arith.constant 0 : i32
    return %c0_i32, %c0_i32_0 : i32, i32
  }
  func.func @transform_2(%arg0: i32) -> (i32, i32) {
    %c0_i32 = arith.constant 0 : i32
    %c0_i32_0 = arith.constant 0 : i32
    return %arg0, %c0_i32 : i32, i32
  }
}

</mosaic_0001>

<bundles_post_ra>
// kernel: tpu_custom_call.1
= control target key start
LH: loop header
LB: loop body
LE: loop exit
PB: predicated region body
PF: predicated region fallthrough
CT: control target
= control target key end

     0   :  { %v866_v2 = vmov 0   ;;  %s1343_s0 = inlined_call_operand.vmem [shape: s32[16,1], index: 0, kind: input, shape index: {}]   ;;  %s1344_s1 = inlined_call_operand.vmem [shape: f32[1024,16], index: 1, kind: input, shape index: {}]   ;;  %s1345_s2 = inlined_call_operand.hbm [shape: f32[16,16], index: 2, kind: output, shape index: {}]  }
   0x1   :  { %v12_v0 = vld [vmem:[%s1343_s0] sm:$0xff]  ;;  %841 = vset.pattern.permute.xlu0 %v866_v2  ;;  %v13_v3 = vld [vmem:[%s1343_s0 + $0x8] sm:$0xff]  ;;  %v95_v14 = vld [vmem:[%s1344_s1 + $0x90] sm:$0xff] }
   0x2   :  { %v93_v1 = vld [vmem:[%s1344_s1 + $0x80] sm:$0xff]  ;;  %v94_v4 = vld [vmem:[%s1344_s1 + $0x88] sm:$0xff]  ;;  %24 = vperm.xlu0 %841, %v12_v0   ;;  %v96_v15 = vld [vmem:[%s1344_s1 + $0x98] sm:$0xff] }
   0x3   :  { %v125_v5 = vld [vmem:[%s1344_s1 + $0x180] sm:$0xff]  ;;  %v126_v6 = vld [vmem:[%s1344_s1 + $0x188] sm:$0xff]  ;;  %v708_v7 = vpack.c.bf16 %v94_v4, %v93_v1  ;;  %v712_v17 = vpack.c.bf16 %v96_v15, %v95_v14  ;;  %v127_v18 = vld [vmem:[%s1344_s1 + $0x190] sm:$0xff] }
   0x4   :  { %v740_v8 = vpack.c.bf16 %v126_v6, %v125_v5  ;;  %v77_v9 = vld [vmem:[%s1344_s1] sm:$0xff]  ;;  %v78_v10 = vld [vmem:[%s1344_s1 + $0x8] sm:$0xff]  ;;  %v128_v19 = vld [vmem:[%s1344_s1 + $0x198] sm:$0xff] }
   0x5   :  { %v109_v11 = vld [vmem:[%s1344_s1 + $0x100] sm:$0xff]  ;;  %v710_v12 = vpack.c.bf16 %v78_v10, %v77_v9  ;;  %v110_v13 = vld [vmem:[%s1344_s1 + $0x108] sm:$0xff]  ;;  %709 = vmatprep.subr.bf16.mxu0 %v708_v7  ;;  %v79_v20 = vld [vmem:[%s1344_s1 + $0x10] sm:$0xff]  ;;  %v744_v21 = vpack.c.bf16 %v128_v19, %v127_v18 }
   0x6   :  { %741 = vmatprep.subr.bf16.mxu1 %v740_v8  ;;  %v742_v16 = vpack.c.bf16 %v110_v13, %v109_v11  ;;  %v80_v22 = vld [vmem:[%s1344_s1 + $0x18] sm:$0xff]  ;;  %v111_v23 = vld [vmem:[%s1344_s1 + $0x110] sm:$0xff]  ;;  %27 = vperm.xlu0 %841, %v13_v3   ;;  %v97_v27 = vld [vmem:[%s1344_s1 + $0xa0] sm:$0xff] }
   0x7   :  { %711 = vmatpush3.bf16.msra.mxu0 %v710_v12  ;;  %v112_v24 = vld [vmem:[%s1344_s1 + $0x118] sm:$0xff]  ;;  %v714_v25 = vpack.c.bf16 %v80_v22, %v79_v20  ;;  %v98_v28 = vld [vmem:[%s1344_s1 + $0xa8] sm:$0xff]  ;;  %v129_v29 = vld [vmem:[%s1344_s1 + $0x1a0] sm:$0xff] }
   0x8   :  { %743 = vmatpush3.bf16.msra.mxu1 %v742_v16  ;;  %v746_v26 = vpack.c.bf16 %v112_v24, %v111_v23  ;;  %713 = vmatprep.subr.bf16.mxu0 %v712_v17  ;;  %v716_v30 = vpack.c.bf16 %v98_v28, %v97_v27  ;;  %v130_v31 = vld [vmem:[%s1344_s1 + $0x1a8] sm:$0xff]  ;;  %v81_v32 = vld [vmem:[%s1344_s1 + $0x20] sm:$0xff]  ;;  %v99_v37 = vld [vmem:[%s1344_s1 + $0xb0] sm:$0xff] }
   0x9   :  { %745 = vmatprep.subr.bf16.mxu1 %v744_v21  ;;  %v82_v33 = vld [vmem:[%s1344_s1 + $0x28] sm:$0xff]  ;;  %v748_v34 = vpack.c.bf16 %v130_v31, %v129_v29  ;;  %v113_v35 = vld [vmem:[%s1344_s1 + $0x120] sm:$0xff]  ;;  %v100_v39 = vld [vmem:[%s1344_s1 + $0xb8] sm:$0xff] }
   0xa   :  { %v114_v36 = vld [vmem:[%s1344_s1 + $0x128] sm:$0xff]  ;;  %v718_v38 = vpack.c.bf16 %v82_v33, %v81_v32  ;;  %v131_v40 = vld [vmem:[%s1344_s1 + $0x1b0] sm:$0xff]  ;;  %v132_v41 = vld [vmem:[%s1344_s1 + $0x1b8] sm:$0xff]  ;;  %v720_v43 = vpack.c.bf16 %v100_v39, %v99_v37 }
   0xb   :  { %715 = vmatpush3.bf16.msra.mxu0 %v714_v25  ;;  %v750_v42 = vpack.c.bf16 %v114_v36, %v113_v35  ;;  %v83_v44 = vld [vmem:[%s1344_s1 + $0x30] sm:$0xff]  ;;  %v84_v45 = vld [vmem:[%s1344_s1 + $0x38] sm:$0xff]  ;;  %v752_v47 = vpack.c.bf16 %v132_v41, %v131_v40  ;;  %v101_v49 = vld [vmem:[%s1344_s1 + $0xc0] sm:$0xff] }
   0xc   :  { %747 = vmatpush3.bf16.msra.mxu1 %v746_v26  ;;  %717 = vmatprep.subr.bf16.mxu0 %v716_v30  ;;  %v115_v46 = vld [vmem:[%s1344_s1 + $0x130] sm:$0xff]  ;;  %v116_v48 = vld [vmem:[%s1344_s1 + $0x138] sm:$0xff]  ;;  %v102_v50 = vld [vmem:[%s1344_s1 + $0xc8] sm:$0xff]  ;;  %v722_v53 = vpack.c.bf16 %v84_v45, %v83_v44 }
   0xd   :  { %749 = vmatprep.subr.bf16.mxu1 %v748_v34  ;;  %v133_v51 = vld [vmem:[%s1344_s1 + $0x1c0] sm:$0xff]  ;;  %v134_v52 = vld [vmem:[%s1344_s1 + $0x1c8] sm:$0xff]  ;;  %v754_v54 = vpack.c.bf16 %v116_v48, %v115_v46  ;;  %v724_v55 = vpack.c.bf16 %v102_v50, %v101_v49  ;;  %v103_v61 = vld [vmem:[%s1344_s1 + $0xd0] sm:$0xff] }
   0xe   :  { %v85_v56 = vld [vmem:[%s1344_s1 + $0x40] sm:$0xff]  ;;  %v86_v57 = vld [vmem:[%s1344_s1 + $0x48] sm:$0xff]  ;;  %v756_v59 = vpack.c.bf16 %v134_v52, %v133_v51  ;;  %v104_v62 = vld [vmem:[%s1344_s1 + $0xd8] sm:$0xff] }
   0xf   :  { %719 = vmatpush3.bf16.msra.mxu0 %v718_v38  ;;  %v117_v58 = vld [vmem:[%s1344_s1 + $0x140] sm:$0xff]  ;;  %v118_v60 = vld [vmem:[%s1344_s1 + $0x148] sm:$0xff]  ;;  %v135_v63 = vld [vmem:[%s1344_s1 + $0x1d0] sm:$0xff]  ;;  %v726_v1 = vpack.c.bf16 %v86_v57, %v85_v56  ;;  %v728_v3 = vpack.c.bf16 %v104_v62, %v103_v61 }
  0x10   :  { %751 = vmatpush3.bf16.msra.mxu1 %v750_v42  ;;  %721 = vmatprep.subr.bf16.mxu0 %v720_v43  ;;  %v136_v0 = vld [vmem:[%s1344_s1 + $0x1d8] sm:$0xff]  ;;  %v758_v2 = vpack.c.bf16 %v118_v60, %v117_v58  ;;  %v87_v4 = vld [vmem:[%s1344_s1 + $0x50] sm:$0xff]  ;;  %v105_v9 = vld [vmem:[%s1344_s1 + $0xe0] sm:$0xff] }
  0x11   :  { %753 = vmatprep.subr.bf16.mxu1 %v752_v47  ;;  %v88_v5 = vld [vmem:[%s1344_s1 + $0x58] sm:$0xff]  ;;  %v119_v6 = vld [vmem:[%s1344_s1 + $0x150] sm:$0xff]  ;;  %v760_v7 = vpack.c.bf16 %v136_v0, %v135_v63  ;;  %v106_v10 = vld [vmem:[%s1344_s1 + $0xe8] sm:$0xff] }
  0x12   :  { %v120_v8 = vld [vmem:[%s1344_s1 + $0x158] sm:$0xff]  ;;  %v137_v11 = vld [vmem:[%s1344_s1 + $0x1e0] sm:$0xff]  ;;  %v138_v12 = vld [vmem:[%s1344_s1 + $0x1e8] sm:$0xff]  ;;  %v730_v13 = vpack.c.bf16 %v88_v5, %v87_v4  ;;  %v732_v15 = vpack.c.bf16 %v106_v10, %v105_v9 }
  0x13   :  { %723 = vmatpush3.bf16.msra.mxu0 %v722_v53  ;;  %v762_v14 = vpack.c.bf16 %v120_v8, %v119_v6  ;;  %v89_v16 = vld [vmem:[%s1344_s1 + $0x60] sm:$0xff]  ;;  %v90_v17 = vld [vmem:[%s1344_s1 + $0x68] sm:$0xff]  ;;  %v764_v19 = vpack.c.bf16 %v138_v12, %v137_v11  ;;  %v107_v21 = vld [vmem:[%s1344_s1 + $0xf0] sm:$0xff] }
  0x14   :  { %755 = vmatpush3.bf16.msra.mxu1 %v754_v54  ;;  %725 = vmatprep.subr.bf16.mxu0 %v724_v55  ;;  %v121_v18 = vld [vmem:[%s1344_s1 + $0x160] sm:$0xff]  ;;  %v122_v20 = vld [vmem:[%s1344_s1 + $0x168] sm:$0xff]  ;;  %v108_v22 = vld [vmem:[%s1344_s1 + $0xf8] sm:$0xff]  ;;  %v734_v25 = vpack.c.bf16 %v90_v17, %v89_v16 }
  0x15   :  { %757 = vmatprep.subr.bf16.mxu1 %v756_v59  ;;  %v139_v23 = vld [vmem:[%s1344_s1 + $0x1f0] sm:$0xff]  ;;  %v140_v24 = vld [vmem:[%s1344_s1 + $0x1f8] sm:$0xff]  ;;  %v766_v26 = vpack.c.bf16 %v122_v20, %v121_v18  ;;  %v736_v27 = vpack.c.bf16 %v108_v22, %v107_v21  ;;  %v157_v33 = vld [vmem:[%s1344_s1 + $0x280] sm:$0xff] }
  0x16   :  { %v91_v28 = vld [vmem:[%s1344_s1 + $0x70] sm:$0xff]  ;;  %v92_v29 = vld [vmem:[%s1344_s1 + $0x78] sm:$0xff]  ;;  %v768_v31 = vpack.c.bf16 %v140_v24, %v139_v23  ;;  %v158_v34 = vld [vmem:[%s1344_s1 + $0x288] sm:$0xff] }
  0x17   :  { %727 = vmatpush3.bf16.msra.mxu0 %v726_v1  ;;  %v123_v30 = vld [vmem:[%s1344_s1 + $0x170] sm:$0xff]  ;;  %v124_v32 = vld [vmem:[%s1344_s1 + $0x178] sm:$0xff]  ;;  %v189_v35 = vld [vmem:[%s1344_s1 + $0x380] sm:$0xff]  ;;  %v738_v37 = vpack.c.bf16 %v92_v29, %v91_v28  ;;  %v772_v39 = vpack.c.bf16 %v158_v34, %v157_v33 }
  0x18   :  { %759 = vmatpush3.bf16.msra.mxu1 %v758_v2  ;;  %729 = vmatprep.subr.bf16.mxu0 %v728_v3  ;;  %v190_v36 = vld [vmem:[%s1344_s1 + $0x388] sm:$0xff]  ;;  %v770_v38 = vpack.c.bf16 %v124_v32, %v123_v30 }
  0x19   :  { %761 = vmatprep.subr.bf16.mxu1 %v760_v7  ;;  %v804_v40 = vpack.c.bf16 %v190_v36, %v189_v35 }
  0x1b   :  { %731 = vmatpush3.bf16.msra.mxu0 %v730_v13 }
  0x1c   :  { %763 = vmatpush3.bf16.msra.mxu1 %v762_v14  ;;  %733 = vmatprep.subr.bf16.mxu0 %v732_v15 }
  0x1d   :  { %765 = vmatprep.subr.bf16.mxu1 %v764_v19 }
  0x1f   :  { %735 = vmatpush3.bf16.msra.mxu0 %v734_v25 }
  0x20   :  { %767 = vmatpush3.bf16.msra.mxu1 %v766_v26  ;;  %737 = vmatprep.subr.bf16.mxu0 %v736_v27 }
  0x21   :  { %769 = vmatprep.subr.bf16.mxu1 %v768_v31 }
  0x23   :  { %739 = vmatpush3.bf16.msra.mxu0 %v738_v37 }
  0x24   :  { %771 = vmatpush3.bf16.msra.mxu1 %v770_v38  ;;  %773 = vmatprep.subr.bf16.mxu0 %v772_v39 }
  0x25   :  { %805 = vmatprep.subr.bf16.mxu1 %v804_v40 }
  0x26   :  { %7 = vsyncpa [#allocation3], 0  ;;  %v14_v41 = vlaneseq  ;;  %v141_v43 = vld [vmem:[%s1344_s1 + $0x200] sm:$0xff]  ;;  %v142_v44 = vld [vmem:[%s1344_s1 + $0x208] sm:$0xff]  ;;  %v867_v63 = vmov 1.0  }
  0x27   :  { %v173_v45 = vld [vmem:[%s1344_s1 + $0x300] sm:$0xff]  ;;  %v174_v46 = vld [vmem:[%s1344_s1 + $0x308] sm:$0xff]  ;;  %v159_v47 = vld [vmem:[%s1344_s1 + $0x290] sm:$0xff]  ;;  %v774_v55 = vpack.c.bf16 %v142_v44, %v141_v43 }
  0x28   :  { %v1096_v42 = vand.u32 127, %v14_v41  ;;  %v160_v51 = vld [vmem:[%s1344_s1 + $0x298] sm:$0xff]  ;;  %v191_v52 = vld [vmem:[%s1344_s1 + $0x390] sm:$0xff]  ;;  %v806_v56 = vpack.c.bf16 %v174_v46, %v173_v45  ;;  %v161_v0 = vld [vmem:[%s1344_s1 + $0x2a0] sm:$0xff] }
  0x29   :  { %v192_v53 = vld [vmem:[%s1344_s1 + $0x398] sm:$0xff]  ;;  %v776_v57 = vpack.c.bf16 %v160_v51, %v159_v47  ;;  %v143_v59 = vld [vmem:[%s1344_s1 + $0x210] sm:$0xff]  ;;  %v162_v1 = vld [vmem:[%s1344_s1 + $0x2a8] sm:$0xff] }
  0x2a   :  { %v16_v48 = vadd.s32 128, %v1096_v42  ;;  %v18_v49 = vadd.s32 384, %v1096_v42  ;;  %v17_v50 = vadd.s32 256, %v1096_v42  ;;  %v808_v58 = vpack.c.bf16 %v192_v53, %v191_v52  ;;  %v144_v60 = vld [vmem:[%s1344_s1 + $0x218] sm:$0xff]  ;;  %v175_v61 = vld [vmem:[%s1344_s1 + $0x310] sm:$0xff]  ;;  %v193_v2 = vld [vmem:[%s1344_s1 + $0x3a0] sm:$0xff] }
  0x2b   :  { %v176_v62 = vld [vmem:[%s1344_s1 + $0x318] sm:$0xff]  ;;  %v194_v3 = vld [vmem:[%s1344_s1 + $0x3a8] sm:$0xff]  ;;  %v778_v5 = vpack.c.bf16 %v144_v60, %v143_v59  ;;  %v1163_v7 = vadd.s32 640, %v1096_v42  ;;  %v1166_v8 = vadd.s32 896, %v1096_v42  ;;  %v145_v9 = vld [vmem:[%s1344_s1 + $0x220] sm:$0xff]  ;;  %v780_v14 = vpack.c.bf16 %v162_v1, %v161_v0 }
  0x2c   :  { %v810_v6 = vpack.c.bf16 %v176_v62, %v175_v61  ;;  %v146_v10 = vld [vmem:[%s1344_s1 + $0x228] sm:$0xff]  ;;  %v177_v11 = vld [vmem:[%s1344_s1 + $0x320] sm:$0xff]  ;;  %v163_v13 = vld [vmem:[%s1344_s1 + $0x2b0] sm:$0xff]  ;;  %v812_v15 = vpack.c.bf16 %v194_v3, %v193_v2 }
  0x2d   :  { %v178_v12 = vld [vmem:[%s1344_s1 + $0x328] sm:$0xff]  ;;  %v164_v16 = vld [vmem:[%s1344_s1 + $0x2b8] sm:$0xff]  ;;  %v195_v17 = vld [vmem:[%s1344_s1 + $0x3b0] sm:$0xff]  ;;  %v782_v19 = vpack.c.bf16 %v146_v10, %v145_v9 }
  0x2e   :  { %v196_v18 = vld [vmem:[%s1344_s1 + $0x3b8] sm:$0xff]  ;;  %v814_v20 = vpack.c.bf16 %v178_v12, %v177_v11  ;;  %v147_v21 = vld [vmem:[%s1344_s1 + $0x230] sm:$0xff]  ;;  %v784_v23 = vpack.c.bf16 %v164_v16, %v163_v13  ;;  %v165_v27 = vld [vmem:[%s1344_s1 + $0x2c0] sm:$0xff] }
  0x2f   :  { %v148_v22 = vld [vmem:[%s1344_s1 + $0x238] sm:$0xff]  ;;  %v816_v24 = vpack.c.bf16 %v196_v18, %v195_v17  ;;  %v179_v25 = vld [vmem:[%s1344_s1 + $0x330] sm:$0xff]  ;;  %v166_v28 = vld [vmem:[%s1344_s1 + $0x2c8] sm:$0xff] }
  0x30   :  { %v180_v26 = vld [vmem:[%s1344_s1 + $0x338] sm:$0xff]  ;;  %v197_v29 = vld [vmem:[%s1344_s1 + $0x3c0] sm:$0xff]  ;;  %v198_v30 = vld [vmem:[%s1344_s1 + $0x3c8] sm:$0xff]  ;;  %v786_v31 = vpack.c.bf16 %v148_v22, %v147_v21  ;;  %v788_v35 = vpack.c.bf16 %v166_v28, %v165_v27 }
  0x31   :  { %v818_v32 = vpack.c.bf16 %v180_v26, %v179_v25  ;;  %v149_v33 = vld [vmem:[%s1344_s1 + $0x240] sm:$0xff]  ;;  %v150_v34 = vld [vmem:[%s1344_s1 + $0x248] sm:$0xff]  ;;  %v820_v36 = vpack.c.bf16 %v198_v30, %v197_v29  ;;  %v167_v39 = vld [vmem:[%s1344_s1 + $0x2d0] sm:$0xff] }
  0x32   :  { %v181_v37 = vld [vmem:[%s1344_s1 + $0x340] sm:$0xff]  ;;  %v182_v38 = vld [vmem:[%s1344_s1 + $0x348] sm:$0xff]  ;;  %v168_v40 = vld [vmem:[%s1344_s1 + $0x2d8] sm:$0xff]  ;;  %v790_v44 = vpack.c.bf16 %v150_v34, %v149_v33 }
  0x33   :  { %v199_v41 = vld [vmem:[%s1344_s1 + $0x3d0] sm:$0xff]  ;;  %v200_v43 = vld [vmem:[%s1344_s1 + $0x3d8] sm:$0xff]  ;;  %v822_v45 = vpack.c.bf16 %v182_v38, %v181_v37  ;;  %v169_v52 = vld [vmem:[%s1344_s1 + $0x2e0] sm:$0xff] }
  0x34   :  { %v151_v46 = vld [vmem:[%s1344_s1 + $0x250] sm:$0xff]  ;;  %v152_v47 = vld [vmem:[%s1344_s1 + $0x258] sm:$0xff]  ;;  %v170_v53 = vld [vmem:[%s1344_s1 + $0x2e8] sm:$0xff] }
  0x35   :  { %v184_v51 = vld [vmem:[%s1344_s1 + $0x358] sm:$0xff]  ;;  %v153_v59 = vld [vmem:[%s1344_s1 + $0x260] sm:$0xff]  ;;  %v154_v60 = vld [vmem:[%s1344_s1 + $0x268] sm:$0xff]  ;;  %v796_v61 = vpack.c.bf16 %v170_v53, %v169_v52 }
  0x36   :  { %v185_v0 = vld [vmem:[%s1344_s1 + $0x360] sm:$0xff]  ;;  %v186_v1 = vld [vmem:[%s1344_s1 + $0x368] sm:$0xff]  ;;  %v171_v2 = vld [vmem:[%s1344_s1 + $0x2f0] sm:$0xff]  ;;  %v798_v9 = vpack.c.bf16 %v154_v60, %v153_v59 }
  0x37   :  { %v172_v3 = vld [vmem:[%s1344_s1 + $0x2f8] sm:$0xff]  ;;  %v830_v10 = vpack.c.bf16 %v186_v1, %v185_v0  ;;  %v155_v11 = vld [vmem:[%s1344_s1 + $0x270] sm:$0xff] }
  0x38   :  { %v800_v12 = vpack.c.bf16 %v172_v3, %v171_v2  ;;  %v188_v16 = vld [vmem:[%s1344_s1 + $0x378] sm:$0xff] }
  0x81   :  { %v1125_v54 = vpop.permute.xlu0 %24 }
  0x82   :  { %vm30_vm0 = vcmp.eq.s32.totalorder %v16_v48, %v1125_v54  ;;  %vm32_vm1 = vcmp.eq.s32.totalorder %v18_v49, %v1125_v54  ;;  %vm29_vm2 = vcmp.eq.s32.totalorder %v1096_v42, %v1125_v54  ;;  %vm31_vm3 = vcmp.eq.s32.totalorder %v17_v50, %v1125_v54 }
  0x83   :  { %540 = vmatprep.mubr.msk.f32.mxu0 %vm30_vm0, %v867_v63  ;;  %544 = vmatprep.mubr.msk.f32.mxu1 %vm32_vm1, %v867_v63  ;;  %vm34_vm8 = vcmp.eq.s32.totalorder %v1163_v7, %v1125_v54  ;;  %vm36_vm9 = vcmp.eq.s32.totalorder %v1166_v8, %v1125_v54  ;;  %vm505_vm0 = vcmask 130048  }
  0x84   :  { %541 = vmatmul.mubr.msk.f32.vlgmr.msra.gmra.mrb[0].mxu0 %vm29_vm2, %v867_v63  ;;  %545 = vmatmul.mubr.msk.f32.vlgmr.msra.gmra.mrb[0].mxu1 %vm31_vm3, %v867_v63 }
  0x85   :  { %775 = vmatpush3.bf16.msra.mxu0 %v774_v55  ;;  %807 = vmatpush3.bf16.msra.mxu1 %v806_v56  ;;  %v1160_v4 = vpop.permute.xlu0 %27  ;;  %v201_v55 = vld [vmem:[%s1344_s1 + $0x3e0] sm:$0xff]  ;;  %v202_v56 = vld [vmem:[%s1344_s1 + $0x3e8] sm:$0xff] }
  0x86   :  { %vm38_vm4 = vcmp.eq.s32.totalorder %v16_v48, %v1160_v4  ;;  %vm40_vm5 = vcmp.eq.s32.totalorder %v18_v49, %v1160_v4  ;;  %777 = vmatprep.subr.bf16.mxu0 %v776_v57  ;;  %809 = vmatprep.subr.bf16.mxu1 %v808_v58  ;;  %vm37_vm6 = vcmp.eq.s32.totalorder %v1096_v42, %v1160_v4 }
  0x87   :  { %542 = vmatprep.mubr.msk.f32.mxu0 %vm38_vm4, %v867_v63  ;;  %546 = vmatprep.mubr.msk.f32.mxu1 %vm40_vm5, %v867_v63  ;;  %vm39_vm7 = vcmp.eq.s32.totalorder %v17_v50, %v1160_v4  ;;  %v792_v48 = vpack.c.bf16 %v168_v40, %v167_v39  ;;  %v824_v49 = vpack.c.bf16 %v200_v43, %v199_v41  ;;  %v183_v50 = vld [vmem:[%s1344_s1 + $0x350] sm:$0xff] }
  0x88   :  { %543 = vmatmul.mubr.msk.f32.gmra.mrb[2].mxu0 %vm37_vm6, %v867_v63  ;;  %547 = vmatmul.mubr.msk.f32.gmra.mrb[2].mxu1 %vm39_vm7, %v867_v63  ;;  %v794_v57 = vpack.c.bf16 %v152_v47, %v151_v46  ;;  %v826_v58 = vpack.c.bf16 %v184_v51, %v183_v50  ;;  %v828_v62 = vpack.c.bf16 %v202_v56, %v201_v55 }
  0x89   :  { %779 = vmatpush3.bf16.msra.mxu0 %v778_v5  ;;  %811 = vmatpush3.bf16.msra.mxu1 %v810_v6  ;;  %v203_v5 = vld [vmem:[%s1344_s1 + $0x3f0] sm:$0xff]  ;;  %v204_v6 = vld [vmem:[%s1344_s1 + $0x3f8] sm:$0xff]  ;;  %vm42_vm12 = vcmp.eq.s32.totalorder %v1163_v7, %v1160_v4  ;;  %vm44_vm13 = vcmp.eq.s32.totalorder %v1166_v8, %v1160_v4 }
  0x8a   :  { %548 = vmatprep.mubr.msk.f32.mxu0 %vm34_vm8, %v867_v63  ;;  %552 = vmatprep.mubr.msk.f32.mxu1 %vm36_vm9, %v867_v63  ;;  %v832_v13 = vpack.c.bf16 %v204_v6, %v203_v5 }
  0x8b   :  { %781 = vmatprep.subr.bf16.mxu0 %v780_v14  ;;  %813 = vmatprep.subr.bf16.mxu1 %v812_v15  ;;  %v156_v14 = vld [vmem:[%s1344_s1 + $0x278] sm:$0xff]  ;;  %v187_v15 = vld [vmem:[%s1344_s1 + $0x370] sm:$0xff]  ;;  %s868_s1 = smov [#allocation2]  }
  0x8c   :  { %v802_v17 = vpack.c.bf16 %v156_v14, %v155_v11  ;;  %v834_v18 = vpack.c.bf16 %v188_v16, %v187_v15  ;;  %s513_s8 = sshll.u32 %s868_s1, 4  ;;  %s514_s8 = int_to_ptr.vmem [resolvable:$true] %s513_s8 }
  0x8d   :  { %783 = vmatpush3.bf16.msra.mxu0 %v782_v19  ;;  %815 = vmatpush3.bf16.msra.mxu1 %v814_v20  ;;  %v19_v19 = vadd.s32 512, %v1096_v42  ;;  %v21_v20 = vadd.s32 768, %v1096_v42  ;;  %s842_s9 = scalar_lea.vmem %s514_s8, 256  ;;  %p847_p1 = scmp.lt.s32.totalorder %s514_s8, %s514_s8 }
  0x8e   :  { %785 = vmatprep.subr.bf16.mxu0 %v784_v23  ;;  %817 = vmatprep.subr.bf16.mxu1 %v816_v24  ;;  %p843_p0 = scmp.ne.s32.totalorder %s514_s8, %s842_s9  ;;  %p848_p2 = scmp.lt.s32.totalorder %s842_s9, %s842_s9 }
  0x8f   :  { %vm33_vm10 = vcmp.eq.s32.totalorder %v19_v19, %v1125_v54  ;;  %vm35_vm11 = vcmp.eq.s32.totalorder %v21_v20, %v1125_v54  ;;  %vm41_vm14 = vcmp.eq.s32.totalorder %v19_v19, %v1160_v4  ;;  %vm43_vm15 = vcmp.eq.s32.totalorder %v21_v20, %v1160_v4 }
  0x90   :  { %p849_p3 = por %p848_p2, %p847_p1 }
  0x91   :  { %787 = vmatpush3.bf16.msra.mxu0 %v786_v31  ;;  %819 = vmatpush3.bf16.msra.mxu1 %v818_v32 }
  0x92   :  { %789 = vmatprep.subr.bf16.mxu0 %v788_v35  ;;  %821 = vmatprep.subr.bf16.mxu1 %v820_v36  ;;  %p850_p4 = pnand %p849_p3, %p843_p0 }
  0x95   :  { %791 = vmatpush3.bf16.msra.mxu0 %v790_v44  ;;  %823 = vmatpush3.bf16.msra.mxu1 %v822_v45 }
  0x96   :  { %793 = vmatprep.subr.bf16.mxu0 %v792_v48  ;;  %825 = vmatprep.subr.bf16.mxu1 %v824_v49 }
  0x99   :  { %795 = vmatpush3.bf16.msra.mxu0 %v794_v57  ;;  %827 = vmatpush3.bf16.msra.mxu1 %v826_v58 }
  0x9a   :  { %797 = vmatprep.subr.bf16.mxu0 %v796_v61  ;;  %829 = vmatprep.subr.bf16.mxu1 %v828_v62 }
  0x9d   :  { %799 = vmatpush3.bf16.msra.mxu0 %v798_v9  ;;  %831 = vmatpush3.bf16.msra.mxu1 %v830_v10 }
  0x9e   :  { %801 = vmatprep.subr.bf16.mxu0 %v800_v12  ;;  %833 = vmatprep.subr.bf16.mxu1 %v832_v13 }
  0xa1   :  { %803 = vmatpush3.bf16.msra.mxu0 %v802_v17  ;;  %835 = vmatpush3.bf16.msra.mxu1 %v834_v18 }
  0xa4   :  { %549 = vmatmul.mubr.msk.f32.vlgmr.msra.gmra.mrb[4].mxu0 %vm33_vm10, %v867_v63  ;;  %553 = vmatmul.mubr.msk.f32.vlgmr.msra.gmra.mrb[4].mxu1 %vm35_vm11, %v867_v63 }
  0xa5   :  { %550 = vmatprep.mubr.msk.f32.mxu0 %vm42_vm12, %v867_v63  ;;  %554 = vmatprep.mubr.msk.f32.mxu1 %vm44_vm13, %v867_v63 }
  0xa8   :  { %551 = vmatmul.mubr.msk.f32.gmra.mrb[6].mxu0 %vm41_vm14, %v867_v63  ;;  %555 = vmatmul.mubr.msk.f32.gmra.mrb[6].mxu1 %vm43_vm15, %v867_v63 }
 0x157   :  { %v588_v42 = vpop.f32.mrb[0].mxu0  ;;  %v626_v54 = vpop.f32.mrb[0].mxu1 }
 0x158   :  { %v589_v21 = vpop.f32.mrb[1].mxu0  ;;  %v627_v22 = vpop.f32.mrb[1].mxu1 }
 0x159   :  { %v590_v7 = vadd.f32 %v589_v21, %v588_v42  ;;  %v628_v23 = vadd.f32 %v627_v22, %v626_v54 }
 0x15b   :  { %v347_v24 = vadd.f32 %v628_v23, %v590_v7  ;;  %v591_v8 = vpop.f32.mrb[2].mxu0  ;;  %v629_v25 = vpop.f32.mrb[2].mxu1 }
 0x15c   :  { %v592_v26 = vpop.f32.mrb[3].mxu0  ;;  %v630_v27 = vpop.f32.mrb[3].mxu1 }
 0x15d   :  { %v593_v28 = vadd.f32 %v592_v26, %v591_v8  ;;  %v631_v29 = vadd.f32 %v630_v27, %v629_v25 }
 0x15f   :  { %v352_v30 = vadd.f32 %v631_v29, %v593_v28 }
 0x177   :  { %v664_v31 = vpop.f32.mrb[4].mxu0  ;;  %v702_v4 = vpop.f32.mrb[4].mxu1 }
 0x178   :  { %v665_v32 = vpop.f32.mrb[5].mxu0  ;;  %v703_v33 = vpop.f32.mrb[5].mxu1 }
 0x179   :  { %v666_v34 = vadd.f32 %v665_v32, %v664_v31  ;;  %v704_v63 = vadd.f32 %v703_v33, %v702_v4 }
 0x17b   :  { %v422_v35 = vadd.f32 %v666_v34, %v347_v24  ;;  %v667_v36 = vpop.f32.mrb[6].mxu0  ;;  %v705_v37 = vpop.f32.mrb[6].mxu1 }
 0x17c   :  { %v668_v38 = vpop.f32.mrb[7].mxu0  ;;  %v706_v39 = vpop.f32.mrb[7].mxu1 }
 0x17d   :  { %v497_v40 = vadd.f32 %v704_v63, %v422_v35  ;;  %v669_v41 = vadd.f32 %v668_v38, %v667_v36  ;;  %v707_v43 = vadd.f32 %v706_v39, %v705_v37 }
 0x17f   :  { %506 = vst.msk [vmem:[#allocation2] sm:$0xff] %vm505_vm0, %v497_v40  ;;  %v427_v44 = vadd.f32 %v669_v41, %v352_v30 }
 0x181   :  { %v502_v45 = vadd.f32 %v707_v43, %v427_v44 }
 0x183   :  { %507 = vst.msk [vmem:[#allocation2 + $0x8] sm:$0xff] %vm505_vm0, %v502_v45 }
 0x184   :  { %853 = shalt.err (!%p850_p4)
}
 0x185   :  { %s854_s12 = scalar_lea.hbm %s1345_s2, 256 }
 0x186   :  { %p855_p5 = scmp.ne.s32.totalorder %s1345_s2, %s854_s12  ;;  %p858_p6 = scmp.lt.u32.totalorder %s854_s12, %s1345_s2 }
 0x188   :  { %p860_p7 = pnand %p858_p6, %p855_p5 }
 0x18a   :  { %863 = shalt.err (!%p860_p7)
}
 0x18b   :  { %s869_s17 = smov 128   ;;  %s870_s18 = smov 8  }
 0x18c   :  { %519 = dma.vmem_to_hbm [thread:$0]  %s514_s8, 256, %s1345_s2, [#allocation3], %s869_s17, %s869_s17, %s870_s18  }
 0x18d   :  { %864 = dma.done.wait [#allocation3], 256  }
 0x18e   :  { %865 = vsyncadd [#allocation3], 4294967040 }
 0x18f   :  { %523 = vsyncpa [#allocation3], 1 }

</bundles_post_ra>
